<compile_context>
chip_gen: v5e
topology: v5e:2x2
jax: 0.10.0
libtpu: 0.0.40
codegen_flags: <defaults>
</compile_context>

<pallas_src>
import math

import jax
import jax.numpy as jnp
from jax.experimental import pallas as pl
from jax.experimental.pallas import tpu as pltpu


def chebconv_kernel(L_ref, x_ref, w_ref, b_ref, o_ref):
    """One batch tile per grid step.

    L_ref : [N, N]                    normalized Laplacian (constant block, compute dtype)
    x_ref : [N, bt*Cin]               batch-folded node features (f32)
    w_ref : [K, bt*Cin, bt*Cout]      per-order block-diagonal weights (compute dtype)
    b_ref : [1, bt*Cout]              batch-folded bias (f32)
    o_ref : [N, bt*Cout]              batch-folded output block (f32)
    """
    korder = w_ref.shape[0]
    cdt = w_ref.dtype                         # compute dtype for MXU operands

    Lc = L_ref[...]                           # [N, N], already in compute dtype
    x = x_ref[...]                            # [N, bt*Cin], f32
    x_c = x.astype(cdt)

    # ---- order 0: T_0(L) @ X = X ------------------------------------------
    acc = jnp.dot(x_c, w_ref[0], preferred_element_type=jnp.float32)   # [N, bt*Cout]

    # ---- feature-space Chebyshev recursion, y_k kept in registers ----------
    if korder > 1:
        y_km2 = x                                                      # f32
        y_km1 = jnp.dot(Lc, x_c, preferred_element_type=jnp.float32)   # T_1 = L @ X
        acc += jnp.dot(y_km1.astype(cdt), w_ref[1],
                       preferred_element_type=jnp.float32)
        for k in range(2, korder):
            y_k = 2.0 * jnp.dot(Lc, y_km1.astype(cdt),
                                preferred_element_type=jnp.float32) - y_km2
            acc += jnp.dot(y_k.astype(cdt), w_ref[k],
                           preferred_element_type=jnp.float32)
            y_km2, y_km1 = y_km1, y_k

    # ---- lane-dense output store (bias broadcasts over rows) ---------------
    o_ref[...] = (acc + b_ref[...]).astype(o_ref.dtype)


def _pick_batch_tile(B, cin, cout, lane_target=256):
    """Choose a batch tile bt so the folded lane width bt*Cin is MXU-friendly.

    Single tile when the whole batch comfortably fits the lane budget;
    otherwise bt*Cin and bt*Cout are forced to multiples of 128 so tiled
    BlockSpecs satisfy the (8, 128) lane rule.
    """
    if B * cin <= 2 * lane_target:
        return B, B                                   # one grid step covers all batches
    u_in = 128 // math.gcd(cin, 128)
    u_out = 128 // math.gcd(cout, 128)
    unit = u_in * u_out // math.gcd(u_in, u_out)      # lcm: keeps both widths 128-aligned
    bt = -(-max(lane_target // cin, 1) // unit) * unit
    if bt >= B:
        return B, B
    b_pad = -(-B // bt) * bt
    return bt, b_pad


def cheb_conv(graph, x, weight, bias, *, use_bf16=False, lane_target=256):
    """Pallas ChebConv forward.  See layout comment above."""
    B, N, cin = x.shape
    korder, w_cin, cout = weight.shape
    assert w_cin == cin
    cdt = jnp.bfloat16 if use_bf16 else jnp.float32

    # ---- normalized Laplacian built once, outside the kernel ---------------
    g = graph.astype(jnp.float32)
    deg = jnp.sum(g, axis=-1)
    d_is = deg ** -0.5        # matches torch deg**(-1/2); isolated nodes -> inf, same as ref
    L = jnp.eye(N, dtype=jnp.float32) - (g * d_is[:, None]) * d_is[None, :]
    Lc = L.astype(cdt)        # one-time cast of the big MXU operand (not per grid step)

    # ---- fold batch into the lane dimension ---------------------------------
    bt, b_pad = _pick_batch_tile(B, cin, cout, lane_target)
    nbt = b_pad // bt

    xf = x.astype(jnp.float32)
    if b_pad != B:
        xf = jnp.pad(xf, ((0, b_pad - B), (0, 0), (0, 0)))
    x_fold = jnp.transpose(xf, (1, 0, 2)).reshape(N, b_pad * cin)      # col = b*Cin + c

    # Per-order weights, block-diagonal over the tile-local batch so that
    # [N, bt*Cin] @ [bt*Cin, bt*Cout] lands lane-dense per batch element.
    eye_bt = jnp.eye(bt, dtype=jnp.float32)
    w_bd = jnp.einsum("jl,kco->kjclo", eye_bt, weight.astype(jnp.float32))
    w_bd = w_bd.reshape(korder, bt * cin, bt * cout).astype(cdt)

    b_fold = jnp.tile(bias.reshape(1, cout).astype(jnp.float32), (1, bt))  # [1, bt*Cout]

    # ---- cost / VMEM accounting for the restructured kernel ----------------
    esz = 2 if use_bf16 else 4
    flops = int(nbt * (2 * max(korder - 1, 0) * N * N * (bt * cin)          # recursion
                       + 2 * korder * N * (bt * cin) * (bt * cout)          # projection
                       + 3 * max(korder - 2, 0) * N * (bt * cin)))          # 2*..-.. elemwise
    bytes_accessed = int(esz * N * N + 4 * b_pad * N * cin
                         + esz * korder * bt * cin * bt * cout
                         + 4 * bt * cout + 4 * b_pad * N * cout)

    vmem_need = (2 * N * N * esz                              # L block (double-buffered)
                 + 2 * N * bt * cin * 4                       # x block
                 + 2 * korder * bt * cin * bt * cout * esz    # weights
                 + 2 * bt * cout * 4                          # bias
                 + 2 * N * bt * cout * 4                      # output block
                 + (korder + 2) * N * bt * cin * 4            # in-register y_k live set
                 + 2 * N * bt * cout * 4)                     # acc + cast temporaries
    vmem_limit = int(min(max(vmem_need + (4 << 20), 32 << 20), 64 << 20))

    out_fold = pl.pallas_call(
        chebconv_kernel,
        out_shape=jax.ShapeDtypeStruct((N, b_pad * cout), jnp.float32),
        grid=(nbt,),
        in_specs=[
            pl.BlockSpec((N, N), lambda i: (0, 0)),                         # L (constant block)
            pl.BlockSpec((N, bt * cin), lambda i: (0, i)),                  # this batch tile
            pl.BlockSpec((korder, bt * cin, bt * cout), lambda i: (0, 0, 0)),  # weights
            pl.BlockSpec((1, bt * cout), lambda i: (0, 0)),                 # bias
        ],
        out_specs=pl.BlockSpec((N, bt * cout), lambda i: (0, i)),
        compiler_params=pltpu.CompilerParams(
            dimension_semantics=("parallel",),
            vmem_limit_bytes=vmem_limit,
        ),
        cost_estimate=pl.CostEstimate(
            flops=flops,
            transcendentals=0,
            bytes_accessed=bytes_accessed,
        ),
    )(Lc, x_fold, w_bd, b_fold)

    # Unfold: [N, B_pad*Cout] -> [B, N, Cout]  (cheap XLA layout plumbing).
    out = out_fold.reshape(N, b_pad, cout).transpose(1, 0, 2)[:B]
    return out


def cheb_conv_ref(graph, x, weight, bias):
    """Pure-JAX reference mirroring the torch forward exactly."""
    N = graph.shape[0]
    deg = jnp.sum(graph, axis=-1)
    D = jnp.diag(deg ** (-0.5))
    L = jnp.eye(N, dtype=jnp.float32) - D @ graph @ D
    korder = weight.shape[0]
    polys = [jnp.eye(N, dtype=jnp.float32), L]
    for _ in range(2, korder):
        polys.append(2.0 * (L @ polys[-1]) - polys[-2])
    mul_L = jnp.stack(polys[:korder], axis=0)                 # [K, N, N]
    res = jnp.einsum("knm,bmc->kbnc", mul_L, x)               # matmul(mul_L.unsqueeze(1), x)
    res = jnp.einsum("kbnc,kco->kbno", res, weight)           # matmul(res, weight)
    return jnp.sum(res, axis=0) + bias                        # [B, N, out_c]


if __name__ == "__main__":
    # Small shapes consistent with the module: N nodes, B batch, in_c -> out_c, order K.
    B, N, in_c, out_c, K = 2, 16, 4, 8, 3          # module stores self.K = K + 1 = 4 orders
    korder = K + 1

    key = jax.random.PRNGKey(0)
    k_g, k_x, k_w = jax.random.split(key, 3)

    # Positive dense "adjacency" so degrees are > 0 (matches traffic-graph usage).
    graph = jax.random.uniform(k_g, (N, N), dtype=jnp.float32, minval=0.1, maxval=1.0)
    graph = 0.5 * (graph + graph.T)

    x = jax.random.normal(k_x, (B, N, in_c), dtype=jnp.float32)

    # Deterministic xavier_normal_-style init for weight [K+1, 1, in_c, out_c].
    fan_in = 1 * in_c * out_c
    fan_out = korder * in_c * out_c
    std = (2.0 / (fan_in + fan_out)) ** 0.5
    weight4d = std * jax.random.normal(k_w, (korder, 1, in_c, out_c), dtype=jnp.float32)
    weight = weight4d[:, 0, :, :]                              # [K+1, in_c, out_c]
    bias = jnp.zeros((1, 1, out_c), dtype=jnp.float32)         # init.zeros_

    ref = cheb_conv_ref(graph, x, weight, bias)

    # Exact-semantics (f32 MXU operands) path: tight tolerance against the reference.
    out_f32 = jax.block_until_ready(cheb_conv(graph, x, weight, bias, use_bf16=False))
    assert out_f32.shape == (B, N, out_c)
    assert jnp.allclose(out_f32, ref, atol=1e-4, rtol=1e-4), "f32 Pallas output mismatch"

    # Fast path: bf16 MXU operands with f32 accumulation (looser tolerance).
    out_bf16 = jax.block_until_ready(cheb_conv(graph, x, weight, bias, use_bf16=True))
    assert out_bf16.shape == (B, N, out_c)
    assert jnp.allclose(out_bf16, ref, atol=5e-2, rtol=5e-2), "bf16 Pallas output mismatch"

    print("KERNEL_OK")
</pallas_src>

<mosaic_0001>
module attributes {stable_mosaic.version = 11 : i64} {
  func.func @chebconv_kernel(%arg0: i32, %arg1: memref<16x16xf32, #tpu.memory_space<vmem>>, %arg2: memref<16x8xf32, #tpu.memory_space<vmem>>, %arg3: memref<4x8x16xf32, #tpu.memory_space<vmem>>, %arg4: memref<1x16xf32, #tpu.memory_space<vmem>>, %arg5: memref<16x16xf32, #tpu.memory_space<vmem>>) attributes {dimension_semantics = [#tpu.dimension_semantics<parallel>], iteration_bounds = array<i64: 1>, scalar_prefetch = 0 : i64, scratch_operands = 0 : i64, tpu.core_type = #tpu.core_type<tc>, window_params = [{pipeline_mode = #tpu.pipeline_mode<synchronous>, transform_indices = @transform_0, window_bounds = array<i64: 16, 16>}, {transform_indices = @transform_1, window_bounds = array<i64: 16, 8>}, {pipeline_mode = #tpu.pipeline_mode<synchronous>, transform_indices = @transform_2, window_bounds = array<i64: 4, 8, 16>}, {pipeline_mode = #tpu.pipeline_mode<synchronous>, transform_indices = @transform_3, window_bounds = array<i64: 1, 16>}, {transform_indices = @transform_4, window_bounds = array<i64: 16, 16>}]} {
    %c0 = arith.constant 0 : index
    %c0_0 = arith.constant 0 : index
    %0 = vector.load %arg1[%c0, %c0_0] : memref<16x16xf32, #tpu.memory_space<vmem>>, vector<16x16xf32>
    %c0_1 = arith.constant 0 : index
    %c0_2 = arith.constant 0 : index
    %1 = vector.load %arg2[%c0_1, %c0_2] : memref<16x8xf32, #tpu.memory_space<vmem>>, vector<16x8xf32>
    %c0_3 = arith.constant 0 : index
    %c0_4 = arith.constant 0 : index
    %c0_5 = arith.constant 0 : index
    %2 = vector.load %arg3[%c0_3, %c0_4, %c0_5] : memref<4x8x16xf32, #tpu.memory_space<vmem>>, vector<1x8x16xf32>
    %3 = vector.shape_cast %2 : vector<1x8x16xf32> to vector<8x16xf32>
    %cst = arith.constant dense<0.000000e+00> : vector<16x16xf32>
    %4 = tpu.matmul %1, %3, %cst {dimension_numbers = #tpu.dot_dimension_numbers<[1], [0], [0], [1], [0, 0, 1, 1], [], []>} : vector<16x8xf32>, vector<8x16xf32>, vector<16x16xf32> -> vector<16x16xf32>
    %cst_6 = arith.constant dense<0.000000e+00> : vector<16x8xf32>
    %5 = tpu.matmul %0, %1, %cst_6 {dimension_numbers = #tpu.dot_dimension_numbers<[1], [0], [0], [1], [0, 0, 1, 1], [], []>} : vector<16x16xf32>, vector<16x8xf32>, vector<16x8xf32> -> vector<16x8xf32>
    %c1 = arith.constant 1 : index
    %c0_7 = arith.constant 0 : index
    %c0_8 = arith.constant 0 : index
    %6 = vector.load %arg3[%c1, %c0_7, %c0_8] : memref<4x8x16xf32, #tpu.memory_space<vmem>>, vector<1x8x16xf32>
    %7 = vector.shape_cast %6 : vector<1x8x16xf32> to vector<8x16xf32>
    %cst_9 = arith.constant dense<0.000000e+00> : vector<16x16xf32>
    %8 = tpu.matmul %5, %7, %cst_9 {dimension_numbers = #tpu.dot_dimension_numbers<[1], [0], [0], [1], [0, 0, 1, 1], [], []>} : vector<16x8xf32>, vector<8x16xf32>, vector<16x16xf32> -> vector<16x16xf32>
    %9 = arith.addf %4, %8 : vector<16x16xf32>
    %cst_10 = arith.constant dense<0.000000e+00> : vector<16x8xf32>
    %10 = tpu.matmul %0, %5, %cst_10 {dimension_numbers = #tpu.dot_dimension_numbers<[1], [0], [0], [1], [0, 0, 1, 1], [], []>} : vector<16x16xf32>, vector<16x8xf32>, vector<16x8xf32> -> vector<16x8xf32>
    %cst_11 = arith.constant 2.000000e+00 : f32
    %11 = vector.broadcast %cst_11 : f32 to vector<16x8xf32>
    %12 = arith.mulf %11, %10 : vector<16x8xf32>
    %13 = arith.subf %12, %1 : vector<16x8xf32>
    %c2 = arith.constant 2 : index
    %c0_12 = arith.constant 0 : index
    %c0_13 = arith.constant 0 : index
    %14 = vector.load %arg3[%c2, %c0_12, %c0_13] : memref<4x8x16xf32, #tpu.memory_space<vmem>>, vector<1x8x16xf32>
    %15 = vector.shape_cast %14 : vector<1x8x16xf32> to vector<8x16xf32>
    %cst_14 = arith.constant dense<0.000000e+00> : vector<16x16xf32>
    %16 = tpu.matmul %13, %15, %cst_14 {dimension_numbers = #tpu.dot_dimension_numbers<[1], [0], [0], [1], [0, 0, 1, 1], [], []>} : vector<16x8xf32>, vector<8x16xf32>, vector<16x16xf32> -> vector<16x16xf32>
    %17 = arith.addf %9, %16 : vector<16x16xf32>
    %cst_15 = arith.constant dense<0.000000e+00> : vector<16x8xf32>
    %18 = tpu.matmul %0, %13, %cst_15 {dimension_numbers = #tpu.dot_dimension_numbers<[1], [0], [0], [1], [0, 0, 1, 1], [], []>} : vector<16x16xf32>, vector<16x8xf32>, vector<16x8xf32> -> vector<16x8xf32>
    %cst_16 = arith.constant 2.000000e+00 : f32
    %19 = vector.broadcast %cst_16 : f32 to vector<16x8xf32>
    %20 = arith.mulf %19, %18 : vector<16x8xf32>
    %21 = arith.subf %20, %5 : vector<16x8xf32>
    %c3 = arith.constant 3 : index
    %c0_17 = arith.constant 0 : index
    %c0_18 = arith.constant 0 : index
    %22 = vector.load %arg3[%c3, %c0_17, %c0_18] : memref<4x8x16xf32, #tpu.memory_space<vmem>>, vector<1x8x16xf32>
    %23 = vector.shape_cast %22 : vector<1x8x16xf32> to vector<8x16xf32>
    %cst_19 = arith.constant dense<0.000000e+00> : vector<16x16xf32>
    %24 = tpu.matmul %21, %23, %cst_19 {dimension_numbers = #tpu.dot_dimension_numbers<[1], [0], [0], [1], [0, 0, 1, 1], [], []>} : vector<16x8xf32>, vector<8x16xf32>, vector<16x16xf32> -> vector<16x16xf32>
    %25 = arith.addf %17, %24 : vector<16x16xf32>
    %c0_20 = arith.constant 0 : index
    %c0_21 = arith.constant 0 : index
    %26 = vector.load %arg4[%c0_20, %c0_21] : memref<1x16xf32, #tpu.memory_space<vmem>>, vector<1x16xf32>
    %27 = vector.broadcast %26 : vector<1x16xf32> to vector<16x16xf32>
    %28 = arith.addf %25, %27 : vector<16x16xf32>
    %c0_22 = arith.constant 0 : index
    %c0_23 = arith.constant 0 : index
    %29 = vector.load %arg5[%c0_22, %c0_23] : memref<16x16xf32, #tpu.memory_space<vmem>>, vector<16x16xf32>
    tpu.vector_store %arg5[%c0_22, %c0_23], %28 {strides = array<i32>} : memref<16x16xf32, #tpu.memory_space<vmem>>, vector<16x16xf32>,
    return
  }
  func.func @transform_0(%arg0: i32) -> (i32, i32) {
    %c0_i32 = arith.constant 0 : i32
    %c0_i32_0 = arith.constant 0 : i32
    %c0_i32_1 = arith.constant 0 : i32
    return %c0_i32, %c0_i32_0 : i32, i32
  }
  func.func @transform_1(%arg0: i32) -> (i32, i32) {
    %c0_i32 = arith.constant 0 : i32
    %c0_i32_0 = arith.constant 0 : i32
    return %c0_i32, %arg0 : i32, i32
  }
  func.func @transform_2(%arg0: i32) -> (i32, i32, i32) {
    %c0_i32 = arith.constant 0 : i32
    %c0_i32_0 = arith.constant 0 : i32
    %c0_i32_1 = arith.constant 0 : i32
    %c0_i32_2 = arith.constant 0 : i32
    return %c0_i32, %c0_i32_0, %c0_i32_1 : i32, i32, i32
  }
  func.func @transform_3(%arg0: i32) -> (i32, i32) {
    %c0_i32 = arith.constant 0 : i32
    %c0_i32_0 = arith.constant 0 : i32
    %c0_i32_1 = arith.constant 0 : i32
    return %c0_i32, %c0_i32_0 : i32, i32
  }
  func.func @transform_4(%arg0: i32) -> (i32, i32) {
    %c0_i32 = arith.constant 0 : i32
    %c0_i32_0 = arith.constant 0 : i32
    return %c0_i32, %arg0 : i32, i32
  }
}

</mosaic_0001>

<bundles_post_ra>
// kernel: tpu_custom_call.1
= control target key start
LH: loop header
LB: loop body
LE: loop exit
PB: predicated region body
PF: predicated region fallthrough
CT: control target
= control target key end

     0   :  { %9 = vsyncpa [#allocation3], 0  ;;  %s422_s0 = inlined_call_operand.vmem [shape: f32[16,16], index: 0, kind: input, shape index: {}]   ;;  %s423_s1 = inlined_call_operand.vmem [shape: f32[16,8], index: 1, kind: input, shape index: {}]   ;;  %s424_s2 = inlined_call_operand.hbm [shape: f32[4,8,16], index: 2, kind: input, shape index: {}]   ;;  %s425_s3 = inlined_call_operand.vmem [shape: f32[1,16], index: 3, kind: input, shape index: {}]   ;;  %s426_s4 = inlined_call_operand.hbm [shape: f32[16,16], index: 4, kind: output, shape index: {}]  }
   0x1   :  { %10 = vsyncpa [#allocation4], 0  ;;  %s19_s17 = sshll.u32 %s424_s2, 4  ;;  %s350_s18 = smov [#allocation2]   ;;  %s20_s17 = int_to_ptr.hbm [resolvable:$true] %s19_s17 }
   0x2   :  { %s21_s19 = sshll.u32 %s350_s18, 4  ;;  %s351_s20 = smov 128   ;;  %s22_s19 = int_to_ptr.vmem [resolvable:$true] %s21_s19 }
   0x3   :  { %s352_s21 = smov 8  }
   0x4   :  { %27 = dma.hbm_to_vmem [thread:$0]  %s20_s17, 512, %s22_s19, [#allocation3], %s351_s20, %s351_s20, %s352_s21  }
   0x5   :  { %346 = dma.done.wait [#allocation3], 512  }
   0x6   :  { %347 = vsyncadd [#allocation3], 4294966784  ;;  %v37_v0 = vld [vmem:[%s423_s1 + $0x8] sm:$0xff]  ;;  %v36_v1 = vld [vmem:[%s423_s1] sm:$0xff]  ;;  %vm39_vm0 = vcmask 130048   ;;  %vm71_vm1 = vcmask 64512  }
   0x7   :  { %v34_v2 = vld [vmem:[%s422_s0] sm:$0xff]  ;;  %60 = vmatpush.msra.mxu0 %v37_v0  ;;  %291 = vmatpush.msra.mxu3 %v37_v0  ;;  %v35_v3 = vld [vmem:[%s422_s0 + $0x8] sm:$0xff]  ;;  %v158_v8 = vld [vmem:[#allocation2 + $0x10] sm:$0xff]  ;;  %s353_s29 = smov [#allocation5]   ;;  %s264_s7 = sshll.u32 %s426_s4, 4  ;;  %s265_s7 = int_to_ptr.hbm [resolvable:$true] %s264_s7 }
   0x8   :  { %v38_v4 = vld [vmem:[#allocation2] sm:$0xff]  ;;  %v70_v5 = vld [vmem:[#allocation2 + $0x8] sm:$0xff]  ;;  %v218_v15 = vld [vmem:[#allocation2 + $0x18] sm:$0xff]  ;;  %s262_s30 = sshll.u32 %s353_s29, 4  ;;  %s263_s30 = int_to_ptr.vmem [resolvable:$true] %s262_s30 }
   0x9   :  { %122 = vmatpush.msra.mxu2 %v38_v4  ;;  %61 = vmatpush.msra.mxu0 %v36_v1  ;;  %v297_v29 = vld [vmem:[%s425_s3] ss:$0 sm:$0xff] }
   0xa   :  { %292 = vmatpush.msra.mxu3 %v36_v1  ;;  %277 = vmatmul.msk.f32.vlgmr.msra.gmra.mxu0 %vm39_vm0, %v34_v2 }
   0xb   :  { %278 = vmatmul.msk.f32.vlgmr.msra.gmra.mxu3 %vm39_vm0, %v35_v3  ;;  %281 = vmatmul.msk.f32.vlgmr.msra.gmra.mxu2 %vm71_vm1, %v36_v1 }
   0xc   :  { %93 = vmatpush.msra.mxu1 %v70_v5  ;;  %240 = vmatpush.msrb.mxu0 %v218_v15 }
   0xe   :  { %180 = vmatpush.msrb.mxu1 %v158_v8 }
  0x13   :  { %282 = vmatmul.msk.f32.gmra.mxu2 %vm71_vm1, %v37_v0 }
  0x87   :  { %v63_v6 = vpop.f32.mrf.mxu0 }
  0x88   :  { %279 = vmatmul.msk.f32.vlgmr.msra.gmra.mxu1 %vm71_vm1, %v63_v6 }
  0x8e   :  { %v66_v7 = vpop.f32.mrf.mxu3  ;;  %v124_v16 = vpop.f32.mrf.mxu2 }
  0x8f   :  { %144 = vmatpush.msrb.mxu3 %v66_v7 }
  0x90   :  { %280 = vmatmul.msk.f32.gmra.mxu1 %vm71_vm1, %v66_v7 }
  0x91   :  { %145 = vmatpush.msrb.mxu3 %v63_v6 }
  0x92   :  { %283 = vmatmul.msk.f32.vlgmr.msrb.gmra.mxu3 %vm39_vm0, %v34_v2 }
  0x96   :  { %v127_v17 = vpop.f32.mrf.mxu2 }
  0x9a   :  { %284 = vmatmul.msk.f32.gmra.mxu3 %vm39_vm0, %v35_v3 }
 0x105   :  { %v95_v24 = vpop.f32.mrf.mxu1 }
 0x106   :  { %v125_v27 = vadd.f32 %v124_v16, %v95_v24 }
 0x10d   :  { %v98_v25 = vpop.f32.mrf.mxu1 }
 0x10e   :  { %v128_v34 = vadd.f32 %v127_v17, %v98_v25 }
 0x115   :  { %v147_v9 = vpop.f32.mrf.mxu3 }
 0x116   :  { %v153_v10 = vmul.f32 2.0, %v147_v9 }
 0x118   :  { %v155_v11 = vsub.f32 %v153_v10, %v36_v1 }
 0x11a   :  { %285 = vmatmul.msk.f32.vlgmr.msrb.gmra.mxu1 %vm71_vm1, %v155_v11 }
 0x11d   :  { %v150_v12 = vpop.f32.mrf.mxu3 }
 0x11e   :  { %v154_v13 = vmul.f32 2.0, %v150_v12 }
 0x120   :  { %v156_v14 = vsub.f32 %v154_v13, %v37_v0 }
 0x122   :  { %286 = vmatmul.msk.f32.gmra.mxu1 %vm71_vm1, %v156_v14  ;;  %204 = vmatpush.msrb.mxu2 %v156_v14 }
 0x124   :  { %205 = vmatpush.msrb.mxu2 %v155_v11 }
 0x125   :  { %287 = vmatmul.msk.f32.vlgmr.msrb.gmra.mxu2 %vm39_vm0, %v34_v2 }
 0x12d   :  { %288 = vmatmul.msk.f32.gmra.mxu2 %vm39_vm0, %v35_v3 }
 0x197   :  { %v182_v26 = vpop.f32.mrf.mxu1 }
 0x198   :  { %v188_v28 = vadd.f32 %v182_v26, %v125_v27 }
 0x19f   :  { %v185_v33 = vpop.f32.mrf.mxu1 }
 0x1a0   :  { %v189_v35 = vadd.f32 %v185_v33, %v128_v34 }
 0x1a8   :  { %v207_v18 = vpop.f32.mrf.mxu2 }
 0x1a9   :  { %v213_v19 = vmul.f32 2.0, %v207_v18 }
 0x1ab   :  { %v215_v20 = vsub.f32 %v213_v19, %v63_v6 }
 0x1ad   :  { %289 = vmatmul.msk.f32.vlgmr.msrb.gmra.mxu0 %vm71_vm1, %v215_v20 }
 0x1b0   :  { %v210_v21 = vpop.f32.mrf.mxu2 }
 0x1b1   :  { %v214_v22 = vmul.f32 2.0, %v210_v21 }
 0x1b3   :  { %v216_v23 = vsub.f32 %v214_v22, %v66_v7 }
 0x1b5   :  { %290 = vmatmul.msk.f32.gmra.mxu0 %vm71_vm1, %v216_v23 }
 0x22a   :  { %v242_v30 = vpop.f32.mrf.mxu0 }
 0x22b   :  { %v248_v31 = vadd.f32 %v242_v30, %v188_v28 }
 0x22d   :  { %v254_v32 = vadd.f32 %v297_v29, %v248_v31 }
 0x22f   :  { %256 = vst.msk [vmem:[#allocation5] sm:$0xff] %vm39_vm0, %v254_v32 }
 0x232   :  { %v245_v36 = vpop.f32.mrf.mxu0 }
 0x233   :  { %v249_v37 = vadd.f32 %v245_v36, %v189_v35 }
 0x235   :  { %v255_v38 = vadd.f32 %v297_v29, %v249_v37 }
 0x237   :  { %257 = vst.msk [vmem:[#allocation5 + $0x8] sm:$0xff] %vm39_vm0, %v255_v38 }
 0x238   :  { %270 = dma.vmem_to_hbm [thread:$0]  %s263_s30, 256, %s265_s7, [#allocation4], %s351_s20, %s351_s20, %s352_s21  }
 0x239   :  { %348 = dma.done.wait [#allocation4], 256  }
 0x23a   :  { %349 = vsyncadd [#allocation4], 4294967040 }
 0x23b   :  { %275 = vsyncpa [#allocation3], 1 }
 0x23c   :  { %276 = vsyncpa [#allocation4], 1 }

</bundles_post_ra>
